<compile_context>
chip_gen: v7x
topology: tpu7x:2x2x1
jax: 0.10.0
libtpu: 0.0.40
codegen_flags: <defaults>
</compile_context>

<pallas_src>
import functools

import jax
import jax.numpy as jnp
from jax.experimental import pallas as pl
from jax.experimental.pallas import tpu as pltpu


def _round_up(x, m):
    return ((x + m - 1) // m) * m


def _dpffb_kernel(x_ref, w_ref, b_ref, o_ref, *, nb, precision):
    # x_ref: (NB, C, T)   activations, channel-major (lane axis = spatial)
    # w_ref: (2C, C)      fused conv weights with BN scale folded in
    # b_ref: (2C, 1)      folded BN bias (f32)
    # o_ref: (NB, 2C, T)  output block (direct NCHW layout)
    w = w_ref[...]
    bias = b_ref[...]
    for i in range(nb):  # nb is a small trace-time constant (<= 8): unrolled
        y = jnp.dot(w, x_ref[i], preferred_element_type=jnp.float32,
                    precision=precision)
        o_ref[i] = jnp.maximum(y + bias, 0.0).astype(o_ref.dtype)


def _choose_tiling(N, C, HW, *, x_bytes, out_bytes, w_bytes,
                   target_step_bytes, vmem_budget_bytes):
    """Pick (nb, t, num_tiles, vmem_limit_bytes)."""
    # HBM traffic per spatial lane per image: x read + out write.
    per_lane = x_bytes * C + out_bytes * 2 * C
    HW128 = _round_up(HW, 128)

    # Spatial tile: 128-multiple sized so one grid step moves ~target_step_bytes.
    t_target = max(128, _round_up(max(1, target_step_bytes // per_lane), 128))
    if t_target >= HW128:
        num_tiles, t = 1, HW128
    else:
        num_tiles = pl.cdiv(HW128, t_target)
        t = _round_up(pl.cdiv(HW128, num_tiles), 128)

    # Keep >= 2 grid steps when possible (v7x has 2 TensorCores; a 1-step
    # "parallel" grid leaves one idle).
    if N * num_tiles < 2 and HW128 >= 256:
        num_tiles = 2
        t = _round_up(pl.cdiv(HW128, num_tiles), 128)

    # For tiny C / tiny images, block several batch images per step so per-step
    # HBM traffic stays near target (amortizes per-step overhead), but never
    # collapse the grid below 2 steps.
    nb = 1
    for cand in range(2, min(N, 8) + 1):
        if N % cand:
            continue
        if cand * per_lane * t > target_step_bytes:
            break
        if (N // cand) * num_tiles >= 2:
            nb = cand

    # VMEM budget (keep <= ~48 MiB so the same tiling fits v7x's 64 MiB VMEM).
    # The constant w_cat/b_cat blocks are still double-buffered by the default
    # pipeline, so their 2x allocation is included here.
    def vmem_est(nb_, t_):
        return (2 * nb_ * C * t_ * x_bytes           # x block, double-buffered
                + 2 * nb_ * 2 * C * t_ * out_bytes   # out block, double-buffered
                + 2 * 2 * C * C * w_bytes            # w_cat (constant, still 2x)
                + 2 * 2 * C * 128 * 4)               # b_cat, lane-padded

    while vmem_est(nb, t) > vmem_budget_bytes:
        if nb > 1:
            nb = 1
        elif t > 128:
            num_tiles *= 2
            t = _round_up(pl.cdiv(HW128, num_tiles), 128)
        else:
            break

    vmem_limit = int(min(max(32 << 20, vmem_est(nb, t) + (4 << 20)), 128 << 20))
    return nb, t, num_tiles, vmem_limit


def dpffb_pallas(x_nchw, params, *, use_bf16=False, precision=None,
                 target_step_bytes=2 << 20, vmem_budget_bytes=48 << 20):
    """DPFFB forward: concat(ReLU(BN(conv1x1_u(x))), ReLU(BN(conv1x1_l(x))), dim=1).

    x_nchw: (N, C, H, W) float32 -> (N, 2C, H, W).

    Eval-mode (running-stats) BatchNorm is folded into the conv weights/bias.
    use_bf16=True halves both HBM streams (bf16 x and bf16 output); the matmul
    still accumulates in f32 and the bias+ReLU epilogue stays in f32, so it is
    valid on v5e/v6e/v7x.  `precision` is forwarded to the in-kernel jnp.dot;
    pass jax.lax.Precision.HIGHEST if exact-f32 matmul accuracy is needed at
    large C (default MXU precision may drift past 1e-5 vs an f32 reference).
    """
    N, C, H, W = x_nchw.shape
    HW = H * W
    eps = 1e-5

    def fold_bn(gamma, beta, mean, var):
        scale = gamma / jnp.sqrt(var + eps)       # (C,)
        bias = beta - mean * scale                # (C,)
        return scale, bias

    su, bu = fold_bn(params["gamma_u"], params["beta_u"],
                     params["mean_u"], params["var_u"])
    sl, bl = fold_bn(params["gamma_l"], params["beta_l"],
                     params["mean_l"], params["var_l"])

    # Fold BN scale into the conv weights (exact: (W x)*s == (s*W) x) and fuse
    # the two branches into one (2C, C) matrix -> one matmul per tile.
    w_u = params["w_upper"] * su[:, None]          # (C, C)
    w_l = params["w_lower"] * sl[:, None]          # (C, C)
    w_cat = jnp.concatenate([w_u, w_l], axis=0)    # (2C, C)
    b_cat = jnp.concatenate([bu, bl], axis=0).reshape(2 * C, 1)
    b_cat = b_cat.astype(jnp.float32)              # epilogue stays f32

    # Channel-major flattened view: no transposes, reshape is free.
    x3 = x_nchw.reshape(N, C, HW)

    if use_bf16:
        x3 = x3.astype(jnp.bfloat16)
        w_cat = w_cat.astype(jnp.bfloat16)
        out_dtype = jnp.bfloat16
    else:
        out_dtype = jnp.float32

    x_bytes = jnp.dtype(x3.dtype).itemsize
    out_bytes = jnp.dtype(out_dtype).itemsize
    w_bytes = jnp.dtype(w_cat.dtype).itemsize

    nb, t, num_tiles, vmem_limit = _choose_tiling(
        N, C, HW, x_bytes=x_bytes, out_bytes=out_bytes, w_bytes=w_bytes,
        target_step_bytes=target_step_bytes,
        vmem_budget_bytes=vmem_budget_bytes)

    # Pad the spatial axis only as far as the 128-multiple tile rounding requires.
    HW_pad = num_tiles * t
    if HW_pad != HW:
        x3 = jnp.pad(x3, ((0, 0), (0, 0), (0, HW_pad - HW)))

    grid = (N // nb, num_tiles)

    kernel = functools.partial(_dpffb_kernel, nb=nb, precision=precision)

    cost = pl.CostEstimate(
        flops=2 * (2 * C) * C * HW * N,
        transcendentals=0,
        bytes_accessed=(N * HW * (C * x_bytes + 2 * C * out_bytes)
                        + 2 * C * C * w_bytes + 2 * C * 4),
    )

    out3 = pl.pallas_call(
        kernel,
        out_shape=jax.ShapeDtypeStruct((N, 2 * C, HW_pad), out_dtype),
        grid_spec=pltpu.PrefetchScalarGridSpec(
            num_scalar_prefetch=0,
            grid=grid,
            in_specs=[
                # x block: (nb, C, t), lane axis = spatial
                pl.BlockSpec((nb, C, t), lambda b, s: (b, 0, s)),
                # fused weights / bias: constant index_map -> fetched once.
                # TODO(synk): pipeline_mode=pl.Buffered(1) would drop their 2x
                # double-buffer; kept default here and budgeted in _choose_tiling.
                pl.BlockSpec((2 * C, C), lambda b, s: (0, 0)),
                pl.BlockSpec((2 * C, 1), lambda b, s: (0, 0)),
            ],
            out_specs=pl.BlockSpec((nb, 2 * C, t), lambda b, s: (b, 0, s)),
        ),
        compiler_params=pltpu.CompilerParams(
            dimension_semantics=("parallel", "parallel"),
            vmem_limit_bytes=vmem_limit),
        cost_estimate=cost,
    )(x3, w_cat, b_cat)

    if HW_pad != HW:
        out3 = out3[:, :, :HW]
    return out3.reshape(N, 2 * C, H, W)


def _reference(x_nchw, params):
    """Plain-JAX reference (matches PyTorch eval-mode forward)."""
    N, C, H, W = x_nchw.shape
    eps = 1e-5
    x_flat = jnp.transpose(x_nchw, (0, 2, 3, 1)).reshape(-1, C)

    def branch(w, g, b, m, v):
        y = x_flat @ w.T
        y = (y - m) / jnp.sqrt(v + eps) * g + b
        return jnp.maximum(y, 0.0)

    up = branch(params["w_upper"], params["gamma_u"], params["beta_u"],
                params["mean_u"], params["var_u"])
    lo = branch(params["w_lower"], params["gamma_l"], params["beta_l"],
                params["mean_l"], params["var_l"])
    out = jnp.concatenate([up, lo], axis=-1)
    return jnp.transpose(out.reshape(N, H, W, 2 * C), (0, 3, 1, 2))


if __name__ == "__main__":
    key = jax.random.PRNGKey(0)
    N, C, H, W = 2, 4, 16, 16

    keys = jax.random.split(key, 10)
    x = jax.random.normal(keys[0], (N, C, H, W), dtype=jnp.float32)

    params = {
        # Conv2d(C, C, k=1, bias=False) weights -> (C_out, C_in)
        "w_upper": jax.random.normal(keys[1], (C, C), dtype=jnp.float32) * 0.5,
        "w_lower": jax.random.normal(keys[2], (C, C), dtype=jnp.float32) * 0.5,
        # BatchNorm2d params (eval-mode running stats), deterministic & nontrivial
        "gamma_u": 1.0 + 0.1 * jax.random.normal(keys[3], (C,), dtype=jnp.float32),
        "beta_u": 0.1 * jax.random.normal(keys[4], (C,), dtype=jnp.float32),
        "mean_u": 0.1 * jax.random.normal(keys[5], (C,), dtype=jnp.float32),
        "var_u": 1.0 + 0.1 * jnp.abs(jax.random.normal(keys[6], (C,), dtype=jnp.float32)),
        "gamma_l": 1.0 + 0.1 * jax.random.normal(keys[7], (C,), dtype=jnp.float32),
        "beta_l": 0.1 * jax.random.normal(keys[8], (C,), dtype=jnp.float32),
        "mean_l": 0.1 * jax.random.normal(keys[9], (C,), dtype=jnp.float32),
        "var_l": jnp.ones((C,), dtype=jnp.float32),
    }
    # TODO(synk): training-mode BatchNorm (batch statistics) is not implemented;
    # eval-mode (running-stats) semantics are used and folded into weights/bias.

    ref = _reference(x, params)

    # f32 path
    out = jax.block_until_ready(dpffb_pallas(x, params))
    assert out.shape == (N, 2 * C, H, W)
    assert jnp.allclose(out, ref, atol=1e-5, rtol=1e-5), "f32 mismatch vs reference"

    # bf16 I/O path (halves both HBM streams; f32 accumulate + f32 epilogue)
    out_bf16 = jax.block_until_ready(dpffb_pallas(x, params, use_bf16=True))
    assert out_bf16.shape == (N, 2 * C, H, W)
    assert out_bf16.dtype == jnp.bfloat16
    assert jnp.allclose(out_bf16.astype(jnp.float32), ref, atol=5e-2, rtol=5e-2), \
        "bf16 mismatch vs reference"

    print("KERNEL_OK")
</pallas_src>

<mosaic_0001>
module attributes {stable_mosaic.version = 11 : i64} {
  func.func @_dpffb_kernel(%arg0: i32, %arg1: i32, %arg2: memref<1x4x256xf32, #tpu.memory_space<vmem>>, %arg3: memref<8x4xf32, #tpu.memory_space<vmem>>, %arg4: memref<8x1xf32, #tpu.memory_space<vmem>>, %arg5: memref<1x8x256xf32, #tpu.memory_space<vmem>>) attributes {dimension_semantics = [#tpu.dimension_semantics<parallel>, #tpu.dimension_semantics<parallel>], iteration_bounds = array<i64: 2, 1>, scalar_prefetch = 0 : i64, scratch_operands = 0 : i64, tpu.core_type = #tpu.core_type<tc>, window_params = [{transform_indices = @transform_0, window_bounds = array<i64: 1, 4, 256>}, {pipeline_mode = #tpu.pipeline_mode<synchronous>, transform_indices = @transform_1, window_bounds = array<i64: 8, 4>}, {pipeline_mode = #tpu.pipeline_mode<synchronous>, transform_indices = @transform_2, window_bounds = array<i64: 8, 1>}, {transform_indices = @transform_3, window_bounds = array<i64: 1, 8, 256>}]} {
    %c0 = arith.constant 0 : index
    %c0_0 = arith.constant 0 : index
    %0 = vector.load %arg3[%c0, %c0_0] : memref<8x4xf32, #tpu.memory_space<vmem>>, vector<8x4xf32>
    %c0_1 = arith.constant 0 : index
    %c0_2 = arith.constant 0 : index
    %1 = vector.load %arg4[%c0_1, %c0_2] : memref<8x1xf32, #tpu.memory_space<vmem>>, vector<8x1xf32>
    %c0_3 = arith.constant 0 : index
    %c0_4 = arith.constant 0 : index
    %c0_5 = arith.constant 0 : index
    %2 = vector.load %arg2[%c0_3, %c0_4, %c0_5] : memref<1x4x256xf32, #tpu.memory_space<vmem>>, vector<1x4x256xf32>
    %3 = vector.shape_cast %2 : vector<1x4x256xf32> to vector<4x256xf32>
    %cst = arith.constant dense<0.000000e+00> : vector<8x256xf32>
    %4 = tpu.matmul %0, %3, %cst {dimension_numbers = #tpu.dot_dimension_numbers<[1], [0], [0], [1], [0, 0, 1, 1], [], []>} : vector<8x4xf32>, vector<4x256xf32>, vector<8x256xf32> -> vector<8x256xf32>
    %5 = vector.broadcast %1 : vector<8x1xf32> to vector<8x256xf32>
    %6 = arith.addf %4, %5 : vector<8x256xf32>
    %cst_6 = arith.constant 0.000000e+00 : f32
    %7 = vector.broadcast %cst_6 : f32 to vector<8x256xf32>
    %8 = arith.maximumf %6, %7 : vector<8x256xf32>
    %c0_7 = arith.constant 0 : index
    %c0_8 = arith.constant 0 : index
    %c0_9 = arith.constant 0 : index
    %9 = vector.load %arg5[%c0_7, %c0_8, %c0_9] : memref<1x8x256xf32, #tpu.memory_space<vmem>>, vector<1x8x256xf32>
    %10 = vector.shape_cast %9 : vector<1x8x256xf32> to vector<8x256xf32>
    %11 = vector.shape_cast %8 : vector<8x256xf32> to vector<1x8x256xf32>
    tpu.vector_store %arg5[%c0_7, %c0_8, %c0_9], %11 {strides = array<i32>} : memref<1x8x256xf32, #tpu.memory_space<vmem>>, vector<1x8x256xf32>,
    return
  }
  func.func @transform_0(%arg0: i32, %arg1: i32) -> (i32, i32, i32) {
    %c0_i32 = arith.constant 0 : i32
    %c0_i32_0 = arith.constant 0 : i32
    return %arg0, %c0_i32, %arg1 : i32, i32, i32
  }
  func.func @transform_1(%arg0: i32, %arg1: i32) -> (i32, i32) {
    %c0_i32 = arith.constant 0 : i32
    %c0_i32_0 = arith.constant 0 : i32
    %c0_i32_1 = arith.constant 0 : i32
    return %c0_i32, %c0_i32_0 : i32, i32
  }
  func.func @transform_2(%arg0: i32, %arg1: i32) -> (i32, i32) {
    %c0_i32 = arith.constant 0 : i32
    %c0_i32_0 = arith.constant 0 : i32
    %c0_i32_1 = arith.constant 0 : i32
    return %c0_i32, %c0_i32_0 : i32, i32
  }
  func.func @transform_3(%arg0: i32, %arg1: i32) -> (i32, i32, i32) {
    %c0_i32 = arith.constant 0 : i32
    %c0_i32_0 = arith.constant 0 : i32
    return %arg0, %c0_i32, %arg1 : i32, i32, i32
  }
}

</mosaic_0001>

<bundles_post_ra>
// kernel: tpu_custom_call.1
= control target key start
LH: loop header
LB: loop body
LE: loop exit
PB: predicated region body
PF: predicated region fallthrough
CT: control target
= control target key end

     0   :  { %8 = vsyncpa [#allocation3], 0  ;;  %s685_s0 = inlined_call_operand.vmem [shape: f32[2,4,256], index: 0, kind: input, shape index: {}]   ;;  %s686_s1 = inlined_call_operand.vmem [shape: f32[8,4], index: 1, kind: input, shape index: {}]   ;;  %s687_s2 = inlined_call_operand.vmem [shape: f32[8,1], index: 2, kind: input, shape index: {}]   ;;  %s688_s3 = inlined_call_operand.hbm [shape: f32[2,8,256], index: 3, kind: output, shape index: {}]  }
   0x1   :  { %10 = vsyncpa [#allocation3 + $0x1], 0  ;;  %s567_s12 = smov 0   ;;  %s569_s13 = smov 0  }
   0x2   :  { %s571_s14 = smov 0   ;;  %s573_s15 = smov 0  }
   0x3   :  { %s575_s16 = smov 0   ;;  %s577_s17 = smov 0  }
   0x4 LB: > { %s387_s18 = sadd.s32 4294967295, %s542_s17   ;;  %s388_s19 = sadd.s32 4294967294, %s542_s17   ;;  %s542_s17 = sphi %s577_s17, %s16_s17   ;;  %s538_s16 = sphi %s575_s16, %s695_s16   ;;  %s534_s15 = sphi %s573_s15, %s694_s15   ;;  %s530_s14 = sphi %s571_s14, %s693_s14   ;;  %s526_s13 = sphi %s569_s13, %s692_s13   ;;  %s522_s12 = sphi %s567_s12, %s691_s12  }
   0x5   : > { %s28_s20 = sadd.s32 1, %s538_s16  ;;  %s107_s21 = sadd.s32 1, %s530_s14 }
   0x6   : > { %p30_p0 = scmp.ge.s32.totalorder %s28_s20, 2  ;;  %p117_p1 = scmp.ne.s32.totalorder %s530_s14, %s526_s13 }
   0x7   : > { %p118_p2 = scmp.eq.s32.totalorder %s387_s18, 1  ;;  %p123_p3 = scmp.ne.s32.totalorder %s526_s13, %s522_s12 }
   0x8   : > { %s697_s20 = smov (%p30_p0, %s28_s20), 0  ;;  %p124_p5 = scmp.eq.s32.totalorder %s388_s19, 1 }
   0x9   : > { %p607_p4 = por %p118_p2, %p117_p1  ;;  %s102_s23 = ssub.s32 %s538_s16, %s697_s20 }
   0xa   : > { %p391_p6 = scmp.ge.s32.totalorder %s542_s17, 1  ;;  %p105_p7 = scmp.eq.s32.totalorder %s102_s23, 0 }
   0xb   : > { %p614_p8 = por %p124_p5, %p123_p3  ;;  %p161_p9 = scmp.lt.s32.totalorder %s542_s17, 3 }
   0xc   : > { %s620_s25 = scalar_select %p105_p7, %s530_s14, %s107_s21  }
   0xd   : > { %p162_p10 = pnand %p391_p6, %p161_p9 }
   0xe   : > { %p190_p11 = scmp.lt.s32.totalorder (!%p162_p10), %s534_s15, 1  ;;  %v544_v0 = vmov (!%p162_p10), 0.0   ;;  %v545_v1 = vmov (!%p162_p10), 0   ;;  %v201_v2 = vld [vmem:[%s687_s2] sm:$0xff] (!%p162_p10)  ;;  %vm214_vm0 = vcmask (!%p162_p10), 1043456   ;;  %vm210_vm1 = vcmask (!%p162_p10), 31744  }
   0xf   : > { %165 = sbr.rel (%p162_p10) target bundleno = 262 (0x106), region = 32  ;;  %283 = vmatprep.mubr.f32.mxu0 (!%p162_p10), %v544_v0  ;;  %462 = vset.pattern.permute.xlu0 (!%p162_p10), %v545_v1  ;;  %v200_v5 = vld [vmem:[%s686_s1] sm:$0xff] (!%p162_p10)  ;;  %s186_s8 = sand.u32 (!%p162_p10), 1, %s526_s13  }
  0x10   : > { %205 = vperm.xlu0 (!%p162_p10), %462, %v201_v2   ;;  %s392_s9 = sshll.u32 (!%p162_p10), %s186_s8, 4  ;;  %s404_s10 = sshll.u32 (!%p162_p10), %s534_s15, 8 }
  0x11   : > { %s188_s11 = scalar_lea.vmem (!%p162_p10), [#allocation2], %s392_s9  ;;  %s638_s23 = scalar_lea.hbm (!%p162_p10), %s688_s3, %s404_s10 }
  0x12   : > { %s311_s18 = sshll.u32 (!%p162_p10), %s188_s11, 4  ;;  %s295_s26 = scalar_lea.sflag (!%p162_p10), [#allocation3], %s186_s8  ;;  %s640_s18 = int_to_ptr.vmem [resolvable:$true] %s311_s18 }
  0x13   : > { %s464_s27 = scalar_lea.vmem (!%p162_p10), %s640_s18, 256 }
  0x14   : > { %p465_p12 = scmp.ne.s32.totalorder (!%p162_p10), %s640_s18, %s464_s27 }
  0x16   : > { %s191_s28 = scalar_select %p190_p11, %s534_s15, 1 }
  0x17   : > { %p466_p13 = pnand %p465_p12, %p607_p4  ;;  %s546_s15 = smov [#allocation2]  }
  0x18   : > { %s403_s29 = sshll.u32 %s191_s28, 3  ;;  %s468_s28 = sshll.u32 %s546_s15, 4  ;;  %s469_s28 = int_to_ptr.vmem [resolvable:$false] %s468_s28 }
  0x19   : > { %s197_s5 = scalar_lea.vmem %s685_s0, %s403_s29  ;;  %p467_p0 = pneg %p466_p13 }
  0x1a   : > { %v202_v3 = vld [vmem:[%s197_s5] sm:$0xff]  ;;  %s470_s29 = scalar_lea.vmem %s469_s28, 512  ;;  %p471_p1 = scmp.lt.s32.totalorder %s640_s18, %s469_s28 }
  0x1b   : > { %v209_v4 = vcombine.high %v202_v3, %v202_v3  ;;  %p472_p2 = scmp.lt.s32.totalorder %s470_s29, %s464_s27 }
  0x1d   : > { %395 = vmatprep.subr.msk.mxu0 %vm214_vm0, %v209_v4  ;;  %p473_p3 = por %p472_p2, %p471_p1 }
  0x1e   : > { %396 = vmatpush1.msk.msra.mxu0 %vm214_vm0, %v202_v3 }
  0x1f   : > { %397 = vmatmul.mubr.msk.f32.vlgmr.msra.gmra.mrb[0].mxu0 %vm210_vm1, %v200_v5  ;;  %p474_p5 = pnand %p473_p3, %p467_p0 }
  0x8f   : > { %v206_v6 = vpop.permute.xlu0 %205 }
  0xf2   : > { %v285_v7 = vpop.f32.mrb[0].mxu0 }
  0xf3   : > { %v286_v8 = vadd.f32 %v285_v7, %v206_v6  ;;  %v287_v9 = vpop.f32.mrb[1].mxu0 }
  0xf4   : > { %v288_v10 = vadd.f32 %v287_v9, %v206_v6 }
  0xf5   : > { %v290_v11 = vmax.f32 %v286_v8, 0.0 }
  0xf6   : > { %v291_v12 = vmax.f32 %v288_v10, 0.0 }
  0xf7   : > { %292 = vst [vmem:[%s188_s11] sm:$0xff] %v290_v11 }
  0xf8   : > { %293 = vst [vmem:[%s188_s11 + $0x8] sm:$0xff] %v291_v12 }
  0xf9   : > { %477 = shalt.err (!%p474_p5)
}
  0xfa   : > { %s478_s30 = scalar_lea.hbm %s638_s23, 256  ;;  %s482_s6 = scalar_lea.hbm %s688_s3, 512 }
  0xfb   : > { %p479_p6 = scmp.ne.s32.totalorder %s638_s23, %s478_s30  ;;  %p483_p10 = scmp.lt.u32.totalorder %s638_s23, %s688_s3 }
  0xfc   : > { %p484_p11 = scmp.lt.u32.totalorder %s482_s6, %s478_s30  ;;  %p486_p13 = scmp.lt.u32.totalorder %s478_s30, %s638_s23 }
  0xfd   : > { %p480_p7 = pnand %p479_p6, %p607_p4 }
  0xfe   : > { %p485_p12 = por %p484_p11, %p483_p10 }
  0xff   : > { %p481_p9 = pneg %p480_p7 }
 0x100   : > { %p487_p0 = por %p486_p13, %p485_p12 }
 0x102   : > { %p488_p1 = pnand %p487_p0, %p481_p9 }
 0x104   : > { %491 = shalt.err (!%p488_p1)
}
 0x105   : > { %405 = dma.vmem_to_hbm [thread:$0]  (%p607_p4), %s640_s18, 256, %s638_s23, %s295_s26  }
 0x106 PF: > { %p411_p2 = scmp.ge.s32.totalorder %s542_s17, 2  ;;  %s323_s9 = sand.u32 1, %s522_s12  }
 0x107   : > { %s324_s10 = scalar_lea.sflag [#allocation3], %s323_s9 }
 0x108   : > { %p408_p3 = pnand %p411_p2, %p614_p8 }
 0x10a   : > { %517 = dma.done.wait (!%p408_p3), %s324_s10, 256  }
 0x10b   : > { %519 = vsyncadd (!%p408_p3), %s324_s10, 4294967040  ;;  %s16_s17 = sadd.s32 1, %s542_s17   ;;  %s691_s12 = smov %s526_s13 }
 0x10c   : > { %p13_p5 = scmp.ge.s32.totalorder %s16_s17, 4   ;;  %s692_s13 = smov %s530_s14 }
 0x10d   : > { %s693_s14 = smov %s620_s25  ;;  %s694_s15 = smov %s538_s16 }
 0x10e   : > { %s695_s16 = smov %s697_s20  ;;  %15 = sbr.rel (!%p13_p5) target bundleno = 4 (0x4), region = 67 }
 0x115   :  { %329 = vsyncpa [#allocation3], 1 }
 0x116   :  { %331 = vsyncpa [#allocation3 + $0x1], 1 }

</bundles_post_ra>
